<compile_context>
chip_gen: v6e
topology: v6e:2x2x1
jax: 0.10.0
libtpu: 0.0.40
codegen_flags: <defaults>
</compile_context>

<pallas_src>
import jax
import jax.numpy as jnp
from jax.experimental import pallas as pl
from jax.experimental.pallas import tpu as pltpu


_LANE = 128
_TARGET_BLOCK_BYTES = 4 << 20          # ~4 MiB per block (amortizes per-step overhead on v7x)
_VMEM_LIMIT_BYTES = 32 * 1024 * 1024   # 2x double-buffered (x + out) 4 MiB blocks + mask << 32 MiB
_MIN_SPLIT_BYTES = 1 << 20             # only force a multi-block grid above this size (v7x 2 TCs)


# ---------------------------------------------------------------------------
# Kernels
# ---------------------------------------------------------------------------

def _masked_mul_kernel(x_ref, m_ref, o_ref):
    # Elementwise hot path: x * mask (mask broadcasts over sublanes / batch).
    o_ref[...] = x_ref[...] * m_ref[...]


def _scalar_scale_kernel(s_ref, x_ref, o_ref):
    # dense_inference path: x * mask.mean()  (f32 scalar lives in SMEM).
    o_ref[...] = (x_ref[...] * s_ref[0, 0]).astype(o_ref.dtype)


# ---------------------------------------------------------------------------
# Tiling helpers
# ---------------------------------------------------------------------------

def _round_up(v, m):
    return ((v + m - 1) // m) * m


def _sublane(dtype):
    # Packed-sublane granule: 8 for 4-byte, 16 for 2-byte, 32 for 1-byte dtypes.
    return {4: 8, 2: 16, 1: 32}.get(jnp.dtype(dtype).itemsize, 8)


def _pick_tiles(N, D, dtype):
    """Pick (TN, TD) block shape for a (N, D) array.

    Invariants:
      * TD is a multiple of 128 or TD == D (lane-dense / full-dim blocks).
      * TN is a multiple of the dtype sublane granule or TN == N.
      * Block bytes ~<= _TARGET_BLOCK_BYTES when possible.
      * >= 2 grid blocks when the array is big enough (keep both v7x TCs busy).
    Ragged edges are handled by the cdiv grid (no padded HBM copies).
    """
    itemsize = jnp.dtype(dtype).itemsize
    sub = _sublane(dtype)
    row_bytes = max(D * itemsize, 1)
    total_bytes = N * row_bytes
    min_tn = N if N <= sub else sub

    if min_tn * row_bytes <= _TARGET_BLOCK_BYTES:
        # Full-width feature tiles -> fully contiguous row DMAs.
        TD = D
        rows = _TARGET_BLOCK_BYTES // row_bytes
        if rows >= N:
            TN = N
        else:
            TN = max(sub, (rows // sub) * sub)
    else:
        # Even a minimal full-width strip blows the budget -> tile features.
        TN = min_tn
        td = _TARGET_BLOCK_BYTES // max(min_tn * itemsize, 1)
        TD = max(_LANE, (td // _LANE) * _LANE)
        if TD >= D:
            TD = D

    # Megacore guard (v7x has 2 TensorCores sharing HBM bandwidth): avoid a
    # single-block grid on arrays big enough to care.
    if total_bytes >= _MIN_SPLIT_BYTES and pl.cdiv(N, TN) * pl.cdiv(D, TD) < 2:
        if N >= 2 * sub:
            TN = max(sub, (pl.cdiv(N, 2) // sub) * sub)
        elif D > _LANE:
            td2 = _round_up(pl.cdiv(D, 2), _LANE)
            if td2 < D:
                TD = td2
    return TN, TD


# ---------------------------------------------------------------------------
# pallas_call wrappers
# ---------------------------------------------------------------------------

def _masked_mul(x2d, m2d, donate_x=False):
    N, D = x2d.shape
    TN, TD = _pick_tiles(N, D, x2d.dtype)

    # Feature axis outer, batch axis inner -> the (1, TD) mask tile keeps the
    # same block index across consecutive batch iterations and stays resident.
    grid = (pl.cdiv(D, TD), pl.cdiv(N, TN))
    extra = {}
    if donate_x:
        extra["input_output_aliases"] = {0: 0}
    return pl.pallas_call(
        _masked_mul_kernel,
        out_shape=jax.ShapeDtypeStruct((N, D), x2d.dtype),
        grid=grid,
        in_specs=[
            pl.BlockSpec((TN, TD), lambda j, i: (i, j)),
            pl.BlockSpec((1, TD), lambda j, i: (0, j)),
        ],
        out_specs=pl.BlockSpec((TN, TD), lambda j, i: (i, j)),
        compiler_params=pltpu.CompilerParams(
            dimension_semantics=("parallel", "parallel"),
            vmem_limit_bytes=_VMEM_LIMIT_BYTES,
        ),
        **extra,
    )(x2d, m2d)


def _scalar_scale(x2d, scalar_f32, donate_x=False):
    N, D = x2d.shape
    TN, TD = _pick_tiles(N, D, x2d.dtype)
    s11 = jnp.reshape(scalar_f32.astype(jnp.float32), (1, 1))

    grid = (pl.cdiv(D, TD), pl.cdiv(N, TN))
    extra = {}
    if donate_x:
        extra["input_output_aliases"] = {1: 0}
    return pl.pallas_call(
        _scalar_scale_kernel,
        out_shape=jax.ShapeDtypeStruct((N, D), x2d.dtype),
        grid=grid,
        in_specs=[
            pl.BlockSpec(memory_space=pltpu.MemorySpace.SMEM),   # (1,1) f32 scalar
            pl.BlockSpec((TN, TD), lambda j, i: (i, j)),
        ],
        out_specs=pl.BlockSpec((TN, TD), lambda j, i: (i, j)),
        compiler_params=pltpu.CompilerParams(
            dimension_semantics=("parallel", "parallel"),
            vmem_limit_bytes=_VMEM_LIMIT_BYTES,
        ),
        **extra,
    )(s11, x2d)


# ---------------------------------------------------------------------------
# Module-equivalent forward
# ---------------------------------------------------------------------------

def masked_activation(x, mask, *, dynamic=False, dense_inference=False,
                      training=True, key=None, donate_input=False):
    """JAX/Pallas equivalent of MaskedActivation.forward.

    x:    (N, C, H, W) activations
    mask: (1, C, H, W) spatial mask (broadcast over N)
    Returns (output, possibly-reshuffled mask).
    """
    if dynamic:
        # reshuffle_mask_: random permutation of the flattened mask (glue, not hot path)
        perm = jax.random.permutation(key, mask.size)
        mask = mask.reshape(-1)[perm].reshape(mask.shape)

    N = x.shape[0]
    D = 1
    for d in x.shape[1:]:
        D *= d
    x2d = x.reshape(N, D)

    if (not training) and dense_inference:
        # One-shot tiny reduction -> plain JAX; the hot scale path is Pallas.
        mean = jnp.mean(mask.astype(jnp.float32))
        y2d = _scalar_scale(x2d, mean, donate_x=donate_input)
    else:
        m2d = mask.astype(x.dtype).reshape(1, D)     # mask matches x.dtype
        y2d = _masked_mul(x2d, m2d, donate_x=donate_input)

    return y2d.reshape(x.shape), mask


# ---------------------------------------------------------------------------
# Main
# ---------------------------------------------------------------------------

if __name__ == "__main__":
    key = jax.random.PRNGKey(0)
    kx, km, kp = jax.random.split(key, 3)

    N, C, H, W = 2, 4, 16, 16
    x = jax.random.normal(kx, (N, C, H, W), dtype=jnp.float32)
    # Binary spatial mask (as float 0/1), like a registered buffer in __init__.
    mask = (jax.random.uniform(km, (1, C, H, W)) < 0.5).astype(jnp.float32)

    # --- training / sparse path: input * mask ------------------------------
    y_train, _ = masked_activation(x, mask, training=True)
    y_train = jax.block_until_ready(y_train)
    ref_train = x * mask
    assert jnp.allclose(y_train, ref_train, atol=1e-6), "train path mismatch"

    # --- eval + dense_inference path: input * mask.mean() ------------------
    y_dense, _ = masked_activation(x, mask, dense_inference=True, training=False)
    y_dense = jax.block_until_ready(y_dense)
    ref_dense = x * jnp.mean(mask)
    assert jnp.allclose(y_dense, ref_dense, atol=1e-5), "dense path mismatch"

    # --- dynamic path: reshuffled mask then multiply ------------------------
    y_dyn, mask_shuf = masked_activation(x, mask, dynamic=True, training=True, key=kp)
    y_dyn = jax.block_until_ready(y_dyn)
    ref_dyn = x * mask_shuf
    assert jnp.allclose(y_dyn, ref_dyn, atol=1e-6), "dynamic path mismatch"

    print("KERNEL_OK")
</pallas_src>

<mosaic_0001>
module attributes {stable_mosaic.version = 11 : i64} {
  func.func @_masked_mul_kernel(%arg0: i32, %arg1: i32, %arg2: memref<2x1024xf32, #tpu.memory_space<vmem>>, %arg3: memref<1x1024xf32, #tpu.memory_space<vmem>>, %arg4: memref<2x1024xf32, #tpu.memory_space<vmem>>) attributes {dimension_semantics = [#tpu.dimension_semantics<parallel>, #tpu.dimension_semantics<parallel>], iteration_bounds = array<i64: 1, 1>, scalar_prefetch = 0 : i64, scratch_operands = 0 : i64, tpu.core_type = #tpu.core_type<tc>, window_params = [{transform_indices = @transform_0, window_bounds = array<i64: 2, 1024>}, {transform_indices = @transform_1, window_bounds = array<i64: 1, 1024>}, {transform_indices = @transform_2, window_bounds = array<i64: 2, 1024>}]} {
    %c0 = arith.constant 0 : index
    %c0_0 = arith.constant 0 : index
    %0 = vector.load %arg2[%c0, %c0_0] : memref<2x1024xf32, #tpu.memory_space<vmem>>, vector<2x1024xf32>
    %c0_1 = arith.constant 0 : index
    %c0_2 = arith.constant 0 : index
    %1 = vector.load %arg3[%c0_1, %c0_2] : memref<1x1024xf32, #tpu.memory_space<vmem>>, vector<1x1024xf32>
    %2 = vector.broadcast %1 : vector<1x1024xf32> to vector<2x1024xf32>
    %3 = arith.mulf %0, %2 : vector<2x1024xf32>
    %c0_3 = arith.constant 0 : index
    %c0_4 = arith.constant 0 : index
    %4 = vector.load %arg4[%c0_3, %c0_4] : memref<2x1024xf32, #tpu.memory_space<vmem>>, vector<2x1024xf32>
    tpu.vector_store %arg4[%c0_3, %c0_4], %3 {strides = array<i32>} : memref<2x1024xf32, #tpu.memory_space<vmem>>, vector<2x1024xf32>,
    return
  }
  func.func @transform_0(%arg0: i32, %arg1: i32) -> (i32, i32) {
    %c0_i32 = arith.constant 0 : i32
    return %arg1, %arg0 : i32, i32
  }
  func.func @transform_1(%arg0: i32, %arg1: i32) -> (i32, i32) {
    %c0_i32 = arith.constant 0 : i32
    %c0_i32_0 = arith.constant 0 : i32
    return %c0_i32, %arg0 : i32, i32
  }
  func.func @transform_2(%arg0: i32, %arg1: i32) -> (i32, i32) {
    %c0_i32 = arith.constant 0 : i32
    return %arg1, %arg0 : i32, i32
  }
}

</mosaic_0001>

<bundles_post_ra>
// kernel: tpu_custom_call.1
= control target key start
LH: loop header
LB: loop body
LE: loop exit
PB: predicated region body
PF: predicated region fallthrough
CT: control target
= control target key end

     0   :  { %7 = vsyncpa [#allocation3], 0  ;;  %s226_s0 = inlined_call_operand.hbm [shape: f32[2,1024], index: 0, kind: input, shape index: {}]   ;;  %s227_s1 = inlined_call_operand.hbm [shape: f32[1,1024], index: 1, kind: input, shape index: {}]   ;;  %s228_s2 = inlined_call_operand.hbm [shape: f32[2,1024], index: 2, kind: output, shape index: {}]  }
   0x1   :  { %8 = vsyncpa [#allocation6], 0 }
   0x2   :  { %9 = vsyncpa [#allocation4], 0  ;;  %s198_s9 = smov [#allocation2]   ;;  %s199_s11 = smov [#allocation5]  }
   0x3   :  { %s16_s10 = sshll.u32 %s198_s9, 4  ;;  %s26_s12 = sshll.u32 %s199_s11, 4  ;;  %s17_s10 = int_to_ptr.vmem [resolvable:$true] %s16_s10  ;;  %s27_s12 = int_to_ptr.vmem [resolvable:$true] %s26_s12 }
   0x4   :  { %s140_s13 = scalar_lea.vmem %s17_s10, 256  ;;  %p145_p1 = scmp.lt.s32.totalorder %s17_s10, %s17_s10 }
   0x5   :  { %p141_p0 = scmp.ne.s32.totalorder %s17_s10, %s140_s13  ;;  %p146_p2 = scmp.lt.s32.totalorder %s140_s13, %s140_s13 }
   0x7   :  { %p147_p3 = por %p146_p2, %p145_p1 }
   0x9   :  { %p148_p4 = pnand %p147_p3, %p141_p0 }
   0xb   :  { %151 = shalt.err (!%p148_p4)
}
   0xc   :  { %19 = dma.hbm_to_vmem [thread:$0]  %s226_s0, 256, %s17_s10, [#allocation3]  }
   0xd   :  { %s160_s16 = scalar_lea.vmem %s27_s12, 128  ;;  %p165_p6 = scmp.lt.s32.totalorder %s27_s12, %s27_s12 }
   0xe   :  { %p161_p5 = scmp.ne.s32.totalorder %s27_s12, %s160_s16  ;;  %p166_p7 = scmp.lt.s32.totalorder %s160_s16, %s160_s16 }
  0x10   :  { %p167_p8 = por %p166_p7, %p165_p6 }
  0x12   :  { %p168_p9 = pnand %p167_p8, %p161_p5 }
  0x14   :  { %171 = shalt.err (!%p168_p9)
}
  0x15   :  { %29 = dma.hbm_to_vmem [thread:$0]  %s227_s1, 128, %s27_s12, [#allocation6]  }
  0x16   :  { %192 = dma.done.wait [#allocation3], 256  }
  0x17   :  { %193 = vsyncadd [#allocation3], 4294967040 }
  0x18   :  { %194 = dma.done.wait [#allocation6], 128  }
  0x19   :  { %195 = vsyncadd [#allocation6], 4294967168  ;;  %v40_v0 = vlaneseq  ;;  %v200_v1 = vmov 1983009808   ;;  %v38_v13 = vld [vmem:[#allocation5] sm:$0xff]  ;;  %v36_v29 = vld [vmem:[#allocation2] sm:$0xff] }
  0x1a   :  { %v75_v2 = vunpack.c.l.s4 %v200_v1  ;;  %v37_v33 = vld [vmem:[#allocation2 + $0x8] sm:$0xff]  ;;  %s201_s0 = smov [#allocation7]  }
  0x1b   :  { %v41_v3 = vshrl.u32 %v40_v0, 7  ;;  %s118_s1 = sshll.u32 %s201_s0, 4  ;;  %s119_s1 = int_to_ptr.vmem [resolvable:$true] %s118_s1 }
  0x1c   :  { %v76_v4 = vunpack.c.0.s8 %v75_v2  ;;  %s172_s19 = scalar_lea.vmem %s119_s1, 256  ;;  %p177_p11 = scmp.lt.s32.totalorder %s119_s1, %s119_s1 }
  0x1d   :  { %v42_v5 = vsub.s32 0, %v41_v3  ;;  %v46_v6 = vsub.s32 1, %v41_v3  ;;  %v50_v7 = vsub.s32 2, %v41_v3  ;;  %v54_v8 = vsub.s32 3, %v41_v3  ;;  %p173_p10 = scmp.ne.s32.totalorder %s119_s1, %s172_s19  ;;  %p178_p12 = scmp.lt.s32.totalorder %s172_s19, %s172_s19 }
  0x1e   :  { %v58_v9 = vsub.s32 4, %v41_v3  ;;  %v62_v10 = vsub.s32 5, %v41_v3  ;;  %v66_v11 = vsub.s32 6, %v41_v3  ;;  %v70_v12 = vsub.s32 7, %v41_v3 }
  0x1f   :  { %v79_v14 = vsub.s32 %v76_v4, %v41_v3  ;;  %v43_v15 = vrot.slane %v38_v13, %v42_v5  ;;  %v47_v16 = vrot.slane %v38_v13, %v46_v6  ;;  %v51_v17 = vrot.slane %v38_v13, %v50_v7  ;;  %p179_p13 = por %p178_p12, %p177_p11 }
  0x20   :  { %v55_v18 = vrot.slane %v38_v13, %v54_v8  ;;  %v59_v19 = vrot.slane %v38_v13, %v58_v9  ;;  %v63_v20 = vrot.slane %v38_v13, %v62_v10  ;;  %v67_v21 = vrot.slane %v38_v13, %v66_v11 }
  0x21   :  { %v71_v22 = vrot.slane %v38_v13, %v70_v12  ;;  %v72_v23 = vcombine.low %v43_v15, %v47_v16  ;;  %p180_p0 = pnand %p179_p13, %p173_p10 }
  0x22   :  { %v73_v24 = vcombine.low %v51_v17, %v55_v18  ;;  %v89_v25 = vcombine.low %v59_v19, %v63_v20 }
  0x23   :  { %v90_v26 = vcombine.low %v67_v21, %v71_v22  ;;  %v80_v27 = vrot.slane %v72_v23, %v79_v14 }
  0x24   :  { %v87_v28 = vrot.slane %v73_v24, %v79_v14  ;;  %v97_v30 = vrot.slane %v89_v25, %v79_v14 }
  0x25   :  { %v104_v31 = vrot.slane %v90_v26, %v79_v14 }
  0x26   :  { %v88_v32 = vcombine.low %v80_v27, %v87_v28 }
  0x27   :  { %v105_v34 = vcombine.low %v97_v30, %v104_v31 }
  0x28   :  { %v108_v35 = vmul.f32 %v88_v32, %v36_v29 }
  0x29   :  { %v109_v36 = vmul.f32 %v105_v34, %v37_v33 }
  0x2a   :  { %110 = vst [vmem:[#allocation7] sm:$0xff] %v108_v35 }
  0x2b   :  { %111 = vst [vmem:[#allocation7 + $0x8] sm:$0xff] %v109_v36 }
  0x2c   :  { %183 = shalt.err (!%p180_p0)
}
  0x2d   :  { %121 = dma.vmem_to_hbm [thread:$0]  %s119_s1, 256, %s228_s2, [#allocation4]  }
  0x2e   :  { %196 = dma.done.wait [#allocation4], 256  }
  0x2f   :  { %197 = vsyncadd [#allocation4], 4294967040 }
  0x30   :  { %125 = vsyncpa [#allocation3], 1 }
  0x31   :  { %126 = vsyncpa [#allocation6], 1 }
  0x32   :  { %127 = vsyncpa [#allocation4], 1 }

</bundles_post_ra>
